<compile_context>
chip_gen: v6e
topology: v6e:2x2x1
jax: 0.10.0
libtpu: 0.0.40
codegen_flags: <defaults>
</compile_context>

<pallas_src>
import jax
import jax.numpy as jnp
from jax.experimental import pallas as pl
from jax.experimental.pallas import tpu as pltpu


def _leaky_relu(x, negative_slope=0.01):
    return jnp.where(x > 0, x, negative_slope * x)


def _round_up(n, m):
    return ((n + m - 1) // m) * m


def discriminator_kernel(x_ref, w1_ref, b1_ref, w2_ref, b2_ref, w3_ref, b3_ref,
                         o_ref):
    # fc1 (MXU, bf16 inputs / f32 accumulate) + leaky_relu. Dropout = identity.
    h1 = jnp.dot(x_ref[...], w1_ref[...],
                 preferred_element_type=jnp.float32) + b1_ref[...]
    h1 = _leaky_relu(h1)

    # fc2 + leaky_relu. Cast activations back to bf16 so the MXU runs at its
    # native bf16 rate; accumulation stays f32. Dropout = identity (eval).
    h2 = jnp.dot(h1.astype(w2_ref.dtype), w2_ref[...],
                 preferred_element_type=jnp.float32) + b2_ref[...]
    h2 = _leaky_relu(h2)

    # fc3 has N=1: a 1-column MXU matmul would still pay a full vmatmul
    # push + result-FIFO pop, so use the otherwise-idle VPU/XLU slots:
    # lane-wise multiply by the (1, 128) weight row, then cross-lane reduce.
    h3 = jnp.sum(h2 * w3_ref[...].astype(jnp.float32), axis=-1,
                 keepdims=True) + b3_ref[...]
    o_ref[...] = jax.nn.sigmoid(h3).astype(o_ref.dtype)


def discriminator_forward(x, params, *, tile_b_max=512,
                          weight_dtype=jnp.bfloat16):
    """x: (B, 784) float32 -> (B, 1) float32."""
    w1, b1, w2, b2, w3, b3 = params
    B, K = x.shape
    H1 = w1.shape[1]          # 256
    H2 = w2.shape[1]          # 128

    # Pad the contraction to a multiple of 128 lanes (784 -> 896). Zero rows
    # of w1 / zero cols of x contribute nothing, so semantics are unchanged.
    K_pad = _round_up(K, 128)

    # Batch tiling: >=512 rows when possible (HBM roofline), multiples of 8.
    tile_b = min(tile_b_max, _round_up(B, 8))
    B_pad = _round_up(B, tile_b)
    grid = (B_pad // tile_b,)

    # Wrapper-side operand prep (pad + bf16 cast fuse into one XLA pass; in a
    # real serving path the weight prep is done once at model-load time).
    x_p = jnp.pad(x, ((0, B_pad - B), (0, K_pad - K))).astype(weight_dtype)
    w1_p = jnp.pad(w1, ((0, K_pad - K), (0, 0))).astype(weight_dtype)
    w2_p = w2.astype(weight_dtype)
    w3_row = w3.reshape(1, H2).astype(weight_dtype)     # (1, 128) row
    b1_p = b1.reshape(1, H1).astype(jnp.float32)
    b2_p = b2.reshape(1, H2).astype(jnp.float32)
    b3_p = b3.reshape(1, 1).astype(jnp.float32)

    const = lambda shape: pl.BlockSpec(shape, lambda i: (0, 0))

    bytes_accessed = (x_p.size * x_p.dtype.itemsize
                      + w1_p.size * 2 + w2_p.size * 2 + w3_row.size * 2
                      + (b1_p.size + b2_p.size + b3_p.size) * 4
                      + B_pad * 4)
    cost = pl.CostEstimate(
        flops=2 * B_pad * (K_pad * H1 + H1 * H2 + H2),
        transcendentals=B_pad,           # sigmoid
        bytes_accessed=bytes_accessed,
    )

    out = pl.pallas_call(
        discriminator_kernel,
        out_shape=jax.ShapeDtypeStruct((B_pad, 1), jnp.float32),
        grid_spec=pltpu.PrefetchScalarGridSpec(
            num_scalar_prefetch=0,
            grid=grid,
            in_specs=[
                pl.BlockSpec((tile_b, K_pad), lambda i: (i, 0)),  # x tile
                const((K_pad, H1)), const((1, H1)),               # w1, b1
                const((H1, H2)), const((1, H2)),                  # w2, b2
                const((1, H2)), const((1, 1)),                    # w3 row, b3
            ],
            out_specs=pl.BlockSpec((tile_b, 1), lambda i: (i, 0)),
        ),
        compiler_params=pltpu.CompilerParams(
            dimension_semantics=("parallel",)),
        cost_estimate=cost,
    )(x_p, w1_p, b1_p, w2_p, b2_p, w3_row, b3_p)

    return out[:B]


def init_params(key):
    """Deterministic init mimicking PyTorch Linear default (U[-1/sqrt(fan_in), +])."""
    dims = [(784, 256), (256, 128), (128, 1)]
    params = []
    for fan_in, fan_out in dims:
        kw, kb, key = jax.random.split(key, 3)
        bound = 1.0 / (fan_in ** 0.5)
        w = jax.random.uniform(kw, (fan_in, fan_out), jnp.float32,
                               minval=-bound, maxval=bound)
        b = jax.random.uniform(kb, (1, fan_out), jnp.float32,
                               minval=-bound, maxval=bound)
        params.extend([w, b])
    return tuple(params)


def reference_forward(x, params):
    w1, b1, w2, b2, w3, b3 = params
    h1 = _leaky_relu(x @ w1 + b1)
    h2 = _leaky_relu(h1 @ w2 + b2)
    return jax.nn.sigmoid(h2 @ w3 + b3)


if __name__ == "__main__":
    key = jax.random.PRNGKey(0)
    kx, kp = jax.random.split(key)

    B = 8  # small batch
    # flattened 1x28x28 MNIST-like input
    x = jax.random.normal(kx, (B, 1 * 28 * 28), dtype=jnp.float32)
    params = init_params(kp)

    out = discriminator_forward(x, params)
    out = jax.block_until_ready(out)

    ref = reference_forward(x, params)
    assert out.shape == (B, 1), out.shape
    # bf16 weights/activations (f32 accumulate) => post-sigmoid error ~1e-3.
    assert jnp.allclose(out, ref, atol=1e-2), (
        float(jnp.max(jnp.abs(out - ref))))

    print("KERNEL_OK")
</pallas_src>

<mosaic_0001>
module attributes {stable_mosaic.version = 11 : i64} {
  func.func @discriminator_kernel(%arg0: i32, %arg1: memref<8x896xbf16, #tpu.memory_space<vmem>>, %arg2: memref<896x256xbf16, #tpu.memory_space<vmem>>, %arg3: memref<1x256xf32, #tpu.memory_space<vmem>>, %arg4: memref<256x128xbf16, #tpu.memory_space<vmem>>, %arg5: memref<1x128xf32, #tpu.memory_space<vmem>>, %arg6: memref<1x128xbf16, #tpu.memory_space<vmem>>, %arg7: memref<1x1xf32, #tpu.memory_space<vmem>>, %arg8: memref<8x1xf32, #tpu.memory_space<vmem>>) attributes {dimension_semantics = [#tpu.dimension_semantics<parallel>], iteration_bounds = array<i64: 1>, scalar_prefetch = 0 : i64, scratch_operands = 0 : i64, tpu.core_type = #tpu.core_type<tc>, window_params = [{transform_indices = @transform_0, window_bounds = array<i64: 8, 896>}, {pipeline_mode = #tpu.pipeline_mode<synchronous>, transform_indices = @transform_1, window_bounds = array<i64: 896, 256>}, {pipeline_mode = #tpu.pipeline_mode<synchronous>, transform_indices = @transform_2, window_bounds = array<i64: 1, 256>}, {pipeline_mode = #tpu.pipeline_mode<synchronous>, transform_indices = @transform_3, window_bounds = array<i64: 256, 128>}, {pipeline_mode = #tpu.pipeline_mode<synchronous>, transform_indices = @transform_4, window_bounds = array<i64: 1, 128>}, {pipeline_mode = #tpu.pipeline_mode<synchronous>, transform_indices = @transform_5, window_bounds = array<i64: 1, 128>}, {pipeline_mode = #tpu.pipeline_mode<synchronous>, transform_indices = @transform_6, window_bounds = array<i64: 1, 1>}, {transform_indices = @transform_7, window_bounds = array<i64: 8, 1>}]} {
    %c0 = arith.constant 0 : index
    %c0_0 = arith.constant 0 : index
    %0 = vector.load %arg1[%c0, %c0_0] : memref<8x896xbf16, #tpu.memory_space<vmem>>, vector<8x896xbf16>
    %c0_1 = arith.constant 0 : index
    %c0_2 = arith.constant 0 : index
    %1 = vector.load %arg2[%c0_1, %c0_2] : memref<896x256xbf16, #tpu.memory_space<vmem>>, vector<896x256xbf16>
    %cst = arith.constant dense<0.000000e+00> : vector<8x256xf32>
    %2 = tpu.matmul %0, %1, %cst {dimension_numbers = #tpu.dot_dimension_numbers<[1], [0], [0], [1], [0, 0, 1, 1], [], []>} : vector<8x896xbf16>, vector<896x256xbf16>, vector<8x256xf32> -> vector<8x256xf32>
    %c0_3 = arith.constant 0 : index
    %c0_4 = arith.constant 0 : index
    %3 = vector.load %arg3[%c0_3, %c0_4] : memref<1x256xf32, #tpu.memory_space<vmem>>, vector<1x256xf32>
    %4 = vector.broadcast %3 : vector<1x256xf32> to vector<8x256xf32>
    %5 = arith.addf %2, %4 : vector<8x256xf32>
    %cst_5 = arith.constant 0.000000e+00 : f32
    %6 = vector.broadcast %cst_5 : f32 to vector<8x256xf32>
    %7 = arith.cmpf ogt, %5, %6 : vector<8x256xf32>
    %cst_6 = arith.constant 0.00999999977 : f32
    %8 = vector.broadcast %cst_6 : f32 to vector<8x256xf32>
    %9 = arith.mulf %8, %5 : vector<8x256xf32>
    %10 = arith.select %7, %5, %9 : vector<8x256xi1>, vector<8x256xf32>
    %11 = arith.truncf %10 : vector<8x256xf32> to vector<8x256xbf16>
    %c0_7 = arith.constant 0 : index
    %c0_8 = arith.constant 0 : index
    %12 = vector.load %arg4[%c0_7, %c0_8] : memref<256x128xbf16, #tpu.memory_space<vmem>>, vector<256x128xbf16>
    %cst_9 = arith.constant dense<0.000000e+00> : vector<8x128xf32>
    %13 = tpu.matmul %11, %12, %cst_9 {dimension_numbers = #tpu.dot_dimension_numbers<[1], [0], [0], [1], [0, 0, 1, 1], [], []>} : vector<8x256xbf16>, vector<256x128xbf16>, vector<8x128xf32> -> vector<8x128xf32>
    %c0_10 = arith.constant 0 : index
    %c0_11 = arith.constant 0 : index
    %14 = vector.load %arg5[%c0_10, %c0_11] : memref<1x128xf32, #tpu.memory_space<vmem>>, vector<1x128xf32>
    %15 = vector.broadcast %14 : vector<1x128xf32> to vector<8x128xf32>
    %16 = arith.addf %13, %15 : vector<8x128xf32>
    %cst_12 = arith.constant 0.000000e+00 : f32
    %17 = vector.broadcast %cst_12 : f32 to vector<8x128xf32>
    %18 = arith.cmpf ogt, %16, %17 : vector<8x128xf32>
    %cst_13 = arith.constant 0.00999999977 : f32
    %19 = vector.broadcast %cst_13 : f32 to vector<8x128xf32>
    %20 = arith.mulf %19, %16 : vector<8x128xf32>
    %21 = arith.select %18, %16, %20 : vector<8x128xi1>, vector<8x128xf32>
    %c0_14 = arith.constant 0 : index
    %c0_15 = arith.constant 0 : index
    %22 = vector.load %arg6[%c0_14, %c0_15] : memref<1x128xbf16, #tpu.memory_space<vmem>>, vector<1x128xbf16>
    %23 = arith.extf %22 : vector<1x128xbf16> to vector<1x128xf32>
    %24 = vector.broadcast %23 : vector<1x128xf32> to vector<8x128xf32>
    %25 = arith.mulf %21, %24 : vector<8x128xf32>
    %cst_16 = arith.constant dense<0.000000e+00> : vector<8xf32>
    %26 = vector.multi_reduction <add>, %25, %cst_16 [1] : vector<8x128xf32> to vector<8xf32>
    %27 = vector.shape_cast %26 : vector<8xf32> to vector<8x1xf32>
    %c0_17 = arith.constant 0 : index
    %c0_18 = arith.constant 0 : index
    %28 = vector.load %arg7[%c0_17, %c0_18] : memref<1x1xf32, #tpu.memory_space<vmem>>, vector<1x1xf32>
    %29 = vector.broadcast %28 : vector<1x1xf32> to vector<8x1xf32>
    %30 = arith.addf %27, %29 : vector<8x1xf32>
    %31 = arith.negf %30 : vector<8x1xf32>
    %32 = math.exp %31 : vector<8x1xf32>
    %cst_19 = arith.constant 1.000000e+00 : f32
    %33 = vector.broadcast %cst_19 : f32 to vector<8x1xf32>
    %34 = arith.addf %33, %32 : vector<8x1xf32>
    %35 = arith.divf %33, %34 : vector<8x1xf32>
    %c0_20 = arith.constant 0 : index
    %c0_21 = arith.constant 0 : index
    %36 = vector.load %arg8[%c0_20, %c0_21] : memref<8x1xf32, #tpu.memory_space<vmem>>, vector<8x1xf32>
    tpu.vector_store %arg8[%c0_20, %c0_21], %35 {strides = array<i32>} : memref<8x1xf32, #tpu.memory_space<vmem>>, vector<8x1xf32>,
    return
  }
  func.func @transform_0(%arg0: i32) -> (i32, i32) {
    %c0_i32 = arith.constant 0 : i32
    %c0_i32_0 = arith.constant 0 : i32
    return %arg0, %c0_i32 : i32, i32
  }
  func.func @transform_1(%arg0: i32) -> (i32, i32) {
    %c0_i32 = arith.constant 0 : i32
    %c0_i32_0 = arith.constant 0 : i32
    %c0_i32_1 = arith.constant 0 : i32
    return %c0_i32, %c0_i32_0 : i32, i32
  }
  func.func @transform_2(%arg0: i32) -> (i32, i32) {
    %c0_i32 = arith.constant 0 : i32
    %c0_i32_0 = arith.constant 0 : i32
    %c0_i32_1 = arith.constant 0 : i32
    return %c0_i32, %c0_i32_0 : i32, i32
  }
  func.func @transform_3(%arg0: i32) -> (i32, i32) {
    %c0_i32 = arith.constant 0 : i32
    %c0_i32_0 = arith.constant 0 : i32
    %c0_i32_1 = arith.constant 0 : i32
    return %c0_i32, %c0_i32_0 : i32, i32
  }
  func.func @transform_4(%arg0: i32) -> (i32, i32) {
    %c0_i32 = arith.constant 0 : i32
    %c0_i32_0 = arith.constant 0 : i32
    %c0_i32_1 = arith.constant 0 : i32
    return %c0_i32, %c0_i32_0 : i32, i32
  }
  func.func @transform_5(%arg0: i32) -> (i32, i32) {
    %c0_i32 = arith.constant 0 : i32
    %c0_i32_0 = arith.constant 0 : i32
    %c0_i32_1 = arith.constant 0 : i32
    return %c0_i32, %c0_i32_0 : i32, i32
  }
  func.func @transform_6(%arg0: i32) -> (i32, i32) {
    %c0_i32 = arith.constant 0 : i32
    %c0_i32_0 = arith.constant 0 : i32
    %c0_i32_1 = arith.constant 0 : i32
    return %c0_i32, %c0_i32_0 : i32, i32
  }
  func.func @transform_7(%arg0: i32) -> (i32, i32) {
    %c0_i32 = arith.constant 0 : i32
    %c0_i32_0 = arith.constant 0 : i32
    return %arg0, %c0_i32 : i32, i32
  }
}

</mosaic_0001>

<bundles_post_ra>
// kernel: tpu_custom_call.1
= control target key start
LH: loop header
LB: loop body
LE: loop exit
PB: predicated region body
PF: predicated region fallthrough
CT: control target
= control target key end

     0   :  { %s1667_s0 = inlined_call_operand.hbm [shape: bf16[8,896], index: 0, kind: input, shape index: {}]   ;;  %s1668_s1 = inlined_call_operand.hbm [shape: bf16[896,256], index: 1, kind: input, shape index: {}]   ;;  %s1669_s2 = inlined_call_operand.vmem [shape: f32[1,256], index: 2, kind: input, shape index: {}]   ;;  %s1670_s3 = inlined_call_operand.hbm [shape: bf16[256,128], index: 3, kind: input, shape index: {}]   ;;  %s1671_s4 = inlined_call_operand.vmem [shape: f32[1,128], index: 4, kind: input, shape index: {}]   ;;  %s1672_s5 = inlined_call_operand.vmem [shape: bf16[1,128], index: 5, kind: input, shape index: {}]   ;;  %s1673_s6 = inlined_call_operand.<no memory space> [shape: f32[1,1], index: 6, kind: input, shape index: {}]   ;;  %s1674_s7 = inlined_call_operand.vmem [shape: f32[8,1], index: 7, kind: output, shape index: {}]  }
   0x1   :  { %v12_v0 = vstv %s1673_s6 }
   0x2   :  { %13 = vst [vmem:[#allocation2] sm:$0x1] %v12_v0 }
   0x3   :  { %14 = vsyncpa [#allocation4], 0 }
   0x4   :  { %15 = vsyncpa [#allocation6], 0  ;;  %s1589_s26 = smov [#allocation5]  }
   0x5   :  { %s31_s27 = sshll.u32 %s1589_s26, 4  ;;  %s32_s27 = int_to_ptr.vmem [resolvable:$true] %s31_s27 }
   0x6   :  { %s1533_s28 = scalar_lea.vmem %s32_s27, 14336  ;;  %p1538_p1 = scmp.lt.s32.totalorder %s32_s27, %s32_s27 }
   0x7   :  { %p1534_p0 = scmp.ne.s32.totalorder %s32_s27, %s1533_s28  ;;  %p1539_p2 = scmp.lt.s32.totalorder %s1533_s28, %s1533_s28 }
   0x9   :  { %p1540_p3 = por %p1539_p2, %p1538_p1 }
   0xb   :  { %p1541_p4 = pnand %p1540_p3, %p1534_p0 }
   0xd   :  { %1544 = shalt.err (!%p1541_p4)
}
   0xe   :  { %s1590_s29 = smov 128   ;;  %s1591_s30 = smov 8  }
   0xf   :  { %37 = dma.hbm_to_vmem [thread:$0]  %s1668_s1, 14336, %s32_s27, [#allocation6], %s1590_s29, %s1590_s29, %s1591_s30  }
  0x10   :  { %s1592_s6 = smov [#allocation3]   ;;  %s1593_s11 = smov [#allocation7]  }
  0x11   :  { %s22_s10 = sshll.u32 %s1592_s6, 4  ;;  %s45_s12 = sshll.u32 %s1593_s11, 4  ;;  %s23_s10 = int_to_ptr.vmem [resolvable:$true] %s22_s10  ;;  %s46_s12 = int_to_ptr.vmem [resolvable:$true] %s45_s12 }
  0x12   :  { %s1553_s13 = scalar_lea.vmem %s23_s10, 448  ;;  %p1558_p6 = scmp.lt.s32.totalorder %s23_s10, %s23_s10 }
  0x13   :  { %p1554_p5 = scmp.ne.s32.totalorder %s23_s10, %s1553_s13  ;;  %p1559_p7 = scmp.lt.s32.totalorder %s1553_s13, %s1553_s13 }
  0x15   :  { %p1560_p8 = por %p1559_p7, %p1558_p6 }
  0x17   :  { %p1561_p9 = pnand %p1560_p8, %p1554_p5 }
  0x19   :  { %1564 = shalt.err (!%p1561_p9)
}
  0x1a   :  { %25 = dma.hbm_to_vmem [thread:$0]  %s1667_s0, 448, %s23_s10, [#allocation4]  }
  0x1b   :  { %s1573_s16 = scalar_lea.vmem %s46_s12, 2048  ;;  %p1578_p11 = scmp.lt.s32.totalorder %s46_s12, %s46_s12 }
  0x1c   :  { %p1574_p10 = scmp.ne.s32.totalorder %s46_s12, %s1573_s16  ;;  %p1579_p12 = scmp.lt.s32.totalorder %s1573_s16, %s1573_s16 }
  0x1e   :  { %p1580_p13 = por %p1579_p12, %p1578_p11 }
  0x20   :  { %p1581_p0 = pnand %p1580_p13, %p1574_p10 }
  0x22   :  { %1584 = shalt.err (!%p1581_p0)
}
  0x23   :  { %s1594_s1 = smov 64   ;;  %s1595_s17 = smov 4  }
  0x24   :  { %51 = dma.hbm_to_vmem [thread:$0]  %s1670_s3, 2048, %s46_s12, [#allocation6], %s1594_s1, %s1594_s1, %s1595_s17  }
  0x25   :  { %1585 = dma.done.wait [#allocation4], 448  }
  0x26   :  { %1586 = vsyncadd [#allocation4], 4294966848 }
  0x27   :  { %1587 = dma.done.wait [#allocation6], 16384  }
  0x28   :  { %1588 = vsyncadd [#allocation6], 4294950912  ;;  %v1330_v1 = vld [vmem:[#allocation5 + $0x74] ss:$8 sps:$4 sm:$0xff]   ;;  %v1332_v2 = vld [vmem:[#allocation5 + $0x70] ss:$8 sps:$4 sm:$0xff]  }
  0x29   :  { %781 = vmatprep.subr.bf16.mxu0 %v1330_v1  ;;  %v1333_v3 = vld [vmem:[#allocation5 + $0x174] ss:$8 sps:$4 sm:$0xff]   ;;  %v1335_v4 = vld [vmem:[#allocation5 + $0x170] ss:$8 sps:$4 sm:$0xff]   ;;  %v1336_v5 = vld [vmem:[#allocation5 + $0x64] ss:$8 sps:$4 sm:$0xff]  }
  0x2a   :  { %782 = vmatpush1.bf16.msra.mxu0 %v1332_v2  ;;  %v1338_v6 = vld [vmem:[#allocation5 + $0x60] ss:$8 sps:$4 sm:$0xff]   ;;  %822 = vmatprep.subr.bf16.mxu1 %v1333_v3  ;;  %v1339_v7 = vld [vmem:[#allocation5 + $0x164] ss:$8 sps:$4 sm:$0xff]   ;;  %v1342_v9 = vld [vmem:[#allocation5 + $0x54] ss:$8 sps:$4 sm:$0xff]  }
  0x2b   :  { %823 = vmatpush1.bf16.msra.mxu1 %v1335_v4  ;;  %783 = vmatprep.subr.bf16.mxu0 %v1336_v5  ;;  %v1341_v8 = vld [vmem:[#allocation5 + $0x160] ss:$8 sps:$4 sm:$0xff]   ;;  %v1344_v10 = vld [vmem:[#allocation5 + $0x50] ss:$8 sps:$4 sm:$0xff]   ;;  %v1345_v11 = vld [vmem:[#allocation5 + $0x154] ss:$8 sps:$4 sm:$0xff]  }
  0x2c   :  { %824 = vmatprep.subr.bf16.mxu1 %v1339_v7  ;;  %v1348_v12 = vld [vmem:[#allocation5 + $0x44] ss:$8 sps:$4 sm:$0xff]   ;;  %v1347_v13 = vld [vmem:[#allocation5 + $0x150] ss:$8 sps:$4 sm:$0xff]   ;;  %v1350_v15 = vld [vmem:[#allocation5 + $0x40] ss:$8 sps:$4 sm:$0xff]  }
  0x2d   :  { %v1351_v14 = vld [vmem:[#allocation5 + $0x144] ss:$8 sps:$4 sm:$0xff]   ;;  %v1354_v16 = vld [vmem:[#allocation5 + $0x34] ss:$8 sps:$4 sm:$0xff]   ;;  %v1353_v17 = vld [vmem:[#allocation5 + $0x140] ss:$8 sps:$4 sm:$0xff]  }
  0x2e   :  { %784 = vmatpush1.bf16.msra.mxu0 %v1338_v6  ;;  %v1357_v18 = vld [vmem:[#allocation5 + $0x134] ss:$8 sps:$4 sm:$0xff]   ;;  %v1356_v19 = vld [vmem:[#allocation5 + $0x30] ss:$8 sps:$4 sm:$0xff]   ;;  %v1360_v20 = vld [vmem:[#allocation5 + $0x24] ss:$8 sps:$4 sm:$0xff]  }
  0x2f   :  { %785 = vmatprep.subr.bf16.mxu0 %v1342_v9  ;;  %825 = vmatpush1.bf16.msra.mxu1 %v1341_v8  ;;  %v1359_v21 = vld [vmem:[#allocation5 + $0x130] ss:$8 sps:$4 sm:$0xff]   ;;  %v1363_v22 = vld [vmem:[#allocation5 + $0x124] ss:$8 sps:$4 sm:$0xff]   ;;  %v1362_v23 = vld [vmem:[#allocation5 + $0x20] ss:$8 sps:$4 sm:$0xff]  }
  0x30   :  { %826 = vmatprep.subr.bf16.mxu1 %v1345_v11  ;;  %v1366_v24 = vld [vmem:[#allocation5 + $0x14] ss:$8 sps:$4 sm:$0xff]   ;;  %v1365_v25 = vld [vmem:[#allocation5 + $0x120] ss:$8 sps:$4 sm:$0xff]   ;;  %v1368_v27 = vld [vmem:[#allocation5 + $0x10] ss:$8 sps:$4 sm:$0xff]  }
  0x31   :  { %v1369_v26 = vld [vmem:[#allocation5 + $0x114] ss:$8 sps:$4 sm:$0xff]   ;;  %v1372_v28 = vld [vmem:[#allocation5 + $0x4] ss:$8 sps:$4 sm:$0xff]   ;;  %v1371_v29 = vld [vmem:[#allocation5 + $0x110] ss:$8 sps:$4 sm:$0xff]  }
  0x32   :  { %786 = vmatpush1.bf16.msra.mxu0 %v1344_v10  ;;  %v1375_v30 = vld [vmem:[#allocation5 + $0x104] ss:$8 sps:$4 sm:$0xff]   ;;  %v1374_v31 = vld [vmem:[#allocation5] ss:$8 sps:$4 sm:$0xff]   ;;  %v1378_v32 = vld [vmem:[#allocation5 + $0xf4] ss:$8 sps:$4 sm:$0xff]  }
  0x33   :  { %787 = vmatprep.subr.bf16.mxu0 %v1348_v12  ;;  %827 = vmatpush1.bf16.msra.mxu1 %v1347_v13  ;;  %v1377_v33 = vld [vmem:[#allocation5 + $0x100] ss:$8 sps:$4 sm:$0xff]   ;;  %v1381_v34 = vld [vmem:[#allocation5 + $0x1f4] ss:$8 sps:$4 sm:$0xff]   ;;  %v1380_v35 = vld [vmem:[#allocation5 + $0xf0] ss:$8 sps:$4 sm:$0xff]  }
  0x34   :  { %828 = vmatprep.subr.bf16.mxu1 %v1351_v14  ;;  %v1384_v36 = vld [vmem:[#allocation5 + $0xe4] ss:$8 sps:$4 sm:$0xff]   ;;  %v1383_v37 = vld [vmem:[#allocation5 + $0x1f0] ss:$8 sps:$4 sm:$0xff]   ;;  %v1386_v39 = vld [vmem:[#allocation5 + $0xe0] ss:$8 sps:$4 sm:$0xff]  }
  0x35   :  { %v1387_v38 = vld [vmem:[#allocation5 + $0x1e4] ss:$8 sps:$4 sm:$0xff]   ;;  %v1390_v40 = vld [vmem:[#allocation5 + $0xd4] ss:$8 sps:$4 sm:$0xff]   ;;  %v1389_v41 = vld [vmem:[#allocation5 + $0x1e0] ss:$8 sps:$4 sm:$0xff]  }
  0x36   :  { %788 = vmatpush1.bf16.msra.mxu0 %v1350_v15  ;;  %v1393_v42 = vld [vmem:[#allocation5 + $0x1d4] ss:$8 sps:$4 sm:$0xff]   ;;  %v1392_v43 = vld [vmem:[#allocation5 + $0xd0] ss:$8 sps:$4 sm:$0xff]   ;;  %v1396_v44 = vld [vmem:[#allocation5 + $0xc4] ss:$8 sps:$4 sm:$0xff]  }
  0x37   :  { %789 = vmatprep.subr.bf16.mxu0 %v1354_v16  ;;  %829 = vmatpush1.bf16.msra.mxu1 %v1353_v17  ;;  %v1395_v45 = vld [vmem:[#allocation5 + $0x1d0] ss:$8 sps:$4 sm:$0xff]   ;;  %v1399_v46 = vld [vmem:[#allocation5 + $0x1c4] ss:$8 sps:$4 sm:$0xff]   ;;  %v1398_v48 = vld [vmem:[#allocation5 + $0xc0] ss:$8 sps:$4 sm:$0xff]  }
  0x38   :  { %830 = vmatprep.subr.bf16.mxu1 %v1357_v18  ;;  %v68_v47 = vld [vmem:[#allocation3] sm:$0xff]  ;;  %v1402_v50 = vld [vmem:[#allocation5 + $0xb4] ss:$8 sps:$4 sm:$0xff]   ;;  %v69_v51 = vld [vmem:[#allocation3 + $0x8] sm:$0xff]  ;;  %v1596_v16 = vmov 0   ;;  %vm1154_vm3 = vcmask 7168  }
  0x39   :  { %v1163_v49 = vcombine.high %v68_v47, %v68_v47  ;;  %v1401_v52 = vld [vmem:[#allocation5 + $0x1c0] ss:$8 sps:$4 sm:$0xff]   ;;  %v1165_v53 = vcombine.high %v69_v51, %v69_v51  ;;  %v1405_v54 = vld [vmem:[#allocation5 + $0x1b4] ss:$8 sps:$4 sm:$0xff]   ;;  %v1404_v55 = vld [vmem:[#allocation5 + $0xb0] ss:$8 sps:$4 sm:$0xff]   ;;  %v1162_v6 = vcombine.low %v68_v47, %v68_v47  ;;  %v1164_v9 = vcombine.low %v69_v51, %v69_v51 }
  0x3a   :  { %790 = vmatpush1.bf16.msra.mxu0 %v1356_v19  ;;  %v1408_v56 = vld [vmem:[#allocation5 + $0xa4] ss:$8 sps:$4 sm:$0xff]   ;;  %v1407_v57 = vld [vmem:[#allocation5 + $0x1b0] ss:$8 sps:$4 sm:$0xff]   ;;  %v1410_v59 = vld [vmem:[#allocation5 + $0xa0] ss:$8 sps:$4 sm:$0xff]  }
  0x3b   :  { %791 = vmatprep.subr.bf16.mxu0 %v1360_v20  ;;  %831 = vmatpush1.bf16.msra.mxu1 %v1359_v21  ;;  %v1411_v58 = vld [vmem:[#allocation5 + $0x1a4] ss:$8 sps:$4 sm:$0xff]   ;;  %v1414_v60 = vld [vmem:[#allocation5 + $0x94] ss:$8 sps:$4 sm:$0xff]   ;;  %v1413_v61 = vld [vmem:[#allocation5 + $0x1a0] ss:$8 sps:$4 sm:$0xff]  }
  0x3c   :  { %832 = vmatprep.subr.bf16.mxu1 %v1363_v22  ;;  %813 = vmatprep.mubr.bf16.mxu0 %v1163_v49  ;;  %v1417_v62 = vld [vmem:[#allocation5 + $0x194] ss:$8 sps:$4 sm:$0xff]   ;;  %v1416_v63 = vld [vmem:[#allocation5 + $0x90] ss:$8 sps:$4 sm:$0xff]   ;;  %v1420_v0 = vld [vmem:[#allocation5 + $0x84] ss:$8 sps:$4 sm:$0xff]  }
  0x3d   :  { %854 = vmatprep.mubr.bf16.mxu1 %v1165_v53  ;;  %v1419_v1 = vld [vmem:[#allocation5 + $0x190] ss:$8 sps:$4 sm:$0xff]   ;;  %v1423_v2 = vld [vmem:[#allocation5 + $0x184] ss:$8 sps:$4 sm:$0xff]   ;;  %v1422_v3 = vld [vmem:[#allocation5 + $0x80] ss:$8 sps:$4 sm:$0xff]  }
  0x3e   :  { %792 = vmatpush1.bf16.msra.mxu0 %v1362_v23  ;;  %v1430_v4 = vld [vmem:[#allocation5 + $0x274] ss:$8 sps:$4 sm:$0xff]   ;;  %v1427_v5 = vld [vmem:[#allocation5 + $0x180] ss:$8 sps:$4 sm:$0xff]   ;;  %v1428_v8 = vld [vmem:[#allocation5 + $0x270] ss:$8 sps:$4 sm:$0xff]  }
  0x3f   :  { %793 = vmatprep.subr.bf16.mxu0 %v1366_v24  ;;  %833 = vmatpush1.bf16.msra.mxu1 %v1365_v25  ;;  %v1456_v7 = vld [vmem:[#allocation5 + $0x374] ss:$8 sps:$4 sm:$0xff]   ;;  %v1435_v10 = vld [vmem:[#allocation5 + $0x264] ss:$8 sps:$4 sm:$0xff]   ;;  %v1454_v11 = vld [vmem:[#allocation5 + $0x370] ss:$8 sps:$4 sm:$0xff]  }
  0x40   :  { %834 = vmatprep.subr.bf16.mxu1 %v1369_v26  ;;  %v1462_v12 = vld [vmem:[#allocation5 + $0x364] ss:$8 sps:$4 sm:$0xff]   ;;  %v1433_v13 = vld [vmem:[#allocation5 + $0x260] ss:$8 sps:$4 sm:$0xff]   ;;  %v1438_v14 = vld [vmem:[#allocation5 + $0x254] ss:$8 sps:$4 sm:$0xff]  }
  0x41   :  { %v1460_v15 = vld [vmem:[#allocation5 + $0x360] ss:$8 sps:$4 sm:$0xff]   ;;  %v1468_v17 = vld [vmem:[#allocation5 + $0x354] ss:$8 sps:$4 sm:$0xff]   ;;  %v1436_v18 = vld [vmem:[#allocation5 + $0x250] ss:$8 sps:$4 sm:$0xff]  }
  0x42   :  { %794 = vmatpush1.bf16.msra.mxu0 %v1368_v27  ;;  %v1441_v19 = vld [vmem:[#allocation5 + $0x244] ss:$8 sps:$4 sm:$0xff]   ;;  %v1439_v20 = vld [vmem:[#allocation5 + $0x240] ss:$8 sps:$4 sm:$0xff]   ;;  %v1466_v21 = vld [vmem:[#allocation5 + $0x350] ss:$8 sps:$4 sm:$0xff]  }
  0x43   :  { %795 = vmatprep.subr.bf16.mxu0 %v1372_v28  ;;  %835 = vmatpush1.bf16.msra.mxu1 %v1371_v29  ;;  %v1474_v22 = vld [vmem:[#allocation5 + $0x344] ss:$8 sps:$4 sm:$0xff]   ;;  %v1444_v23 = vld [vmem:[#allocation5 + $0x234] ss:$8 sps:$4 sm:$0xff]   ;;  %v1472_v24 = vld [vmem:[#allocation5 + $0x340] ss:$8 sps:$4 sm:$0xff]  }
  0x44   :  { %836 = vmatprep.subr.bf16.mxu1 %v1375_v30  ;;  %v1480_v25 = vld [vmem:[#allocation5 + $0x334] ss:$8 sps:$4 sm:$0xff]   ;;  %v1442_v27 = vld [vmem:[#allocation5 + $0x230] ss:$8 sps:$4 sm:$0xff]   ;;  %v1447_v29 = vld [vmem:[#allocation5 + $0x224] ss:$8 sps:$4 sm:$0xff]  }
  0x45   :  { %v1649_v26 = vld [vmem:[#allocation3 + $0x10] sm:$0xff]  ;;  %v1477_v49 = vld [vmem:[#allocation5 + $0x2c4] ss:$8 sps:$4 sm:$0xff]  }
  0x46   :  { %796 = vmatpush1.bf16.msra.mxu0 %v1374_v31  ;;  %v1167_v28 = vcombine.high %v1649_v26, %v1649_v26  ;;  %v1478_v30 = vld [vmem:[#allocation5 + $0x330] ss:$8 sps:$4 sm:$0xff]   ;;  %v1486_v31 = vld [vmem:[#allocation5 + $0x324] ss:$8 sps:$4 sm:$0xff]   ;;  %v1471_v47 = vld [vmem:[#allocation5 + $0x2d4] ss:$8 sps:$4 sm:$0xff]  }
  0x47   :  { %797 = vmatprep.subr.bf16.mxu0 %v1378_v32  ;;  %837 = vmatpush1.bf16.msra.mxu1 %v1377_v33  ;;  %v1445_v32 = vld [vmem:[#allocation5 + $0x220] ss:$8 sps:$4 sm:$0xff]   ;;  %v1450_v33 = vld [vmem:[#allocation5 + $0x214] ss:$8 sps:$4 sm:$0xff]   ;;  %v1489_v53 = vld [vmem:[#allocation5 + $0x2a4] ss:$8 sps:$4 sm:$0xff]  }
  0x48   :  { %838 = vmatprep.subr.bf16.mxu1 %v1381_v34  ;;  %v1484_v34 = vld [vmem:[#allocation5 + $0x320] ss:$8 sps:$4 sm:$0xff]   ;;  %v1483_v51 = vld [vmem:[#allocation5 + $0x2b4] ss:$8 sps:$4 sm:$0xff]  }
  0x4a   :  { %798 = vmatpush2.bf16.msra.mxu0 %v1380_v35  ;;  %v1492_v35 = vld [vmem:[#allocation5 + $0x314] ss:$8 sps:$4 sm:$0xff]  }
  0x4b   :  { %799 = vmatprep.subr.bf16.mxu0 %v1384_v36  ;;  %839 = vmatpush2.bf16.msra.mxu1 %v1383_v37  ;;  %v1448_v36 = vld [vmem:[#allocation5 + $0x210] ss:$8 sps:$4 sm:$0xff]   ;;  %v1453_v37 = vld [vmem:[#allocation5 + $0x204] ss:$8 sps:$4 sm:$0xff]  }
  0x4c   :  { %840 = vmatprep.subr.bf16.mxu1 %v1387_v38  ;;  %v1490_v38 = vld [vmem:[#allocation5 + $0x310] ss:$8 sps:$4 sm:$0xff]  }
  0x4e   :  { %800 = vmatpush2.bf16.msra.mxu0 %v1386_v39  ;;  %v1498_v39 = vld [vmem:[#allocation5 + $0x304] ss:$8 sps:$4 sm:$0xff]  }
  0x4f   :  { %801 = vmatprep.subr.bf16.mxu0 %v1390_v40  ;;  %841 = vmatpush2.bf16.msra.mxu1 %v1389_v41  ;;  %v1451_v40 = vld [vmem:[#allocation5 + $0x200] ss:$8 sps:$4 sm:$0xff]   ;;  %v1459_v41 = vld [vmem:[#allocation5 + $0x2f4] ss:$8 sps:$4 sm:$0xff]  }
  0x50   :  { %842 = vmatprep.subr.bf16.mxu1 %v1393_v42  ;;  %v1496_v42 = vld [vmem:[#allocation5 + $0x300] ss:$8 sps:$4 sm:$0xff]  }
  0x52   :  { %802 = vmatpush2.bf16.msra.mxu0 %v1392_v43  ;;  %v1457_v43 = vld [vmem:[#allocation5 + $0x2f0] ss:$8 sps:$4 sm:$0xff]  }
  0x53   :  { %803 = vmatprep.subr.bf16.mxu0 %v1396_v44  ;;  %843 = vmatpush2.bf16.msra.mxu1 %v1395_v45  ;;  %v1465_v44 = vld [vmem:[#allocation5 + $0x2e4] ss:$8 sps:$4 sm:$0xff]   ;;  %v1502_v45 = vld [vmem:[#allocation3 + $0x18] ss:$0 sps:$4 sm:$0xff]  }
  0x54   :  { %844 = vmatprep.subr.bf16.mxu1 %v1399_v46  ;;  %v1463_v46 = vld [vmem:[#allocation5 + $0x2e0] ss:$8 sps:$4 sm:$0xff]  }
  0x56   :  { %804 = vmatpush2.bf16.msra.mxu0 %v1398_v48  ;;  %v1469_v48 = vld [vmem:[#allocation5 + $0x2d0] ss:$8 sps:$4 sm:$0xff]  }
  0x57   :  { %805 = vmatprep.subr.bf16.mxu0 %v1402_v50  ;;  %845 = vmatpush2.bf16.msra.mxu1 %v1401_v52  ;;  %v1475_v50 = vld [vmem:[#allocation5 + $0x2c0] ss:$8 sps:$4 sm:$0xff]   ;;  %v1481_v52 = vld [vmem:[#allocation5 + $0x2b0] ss:$8 sps:$4 sm:$0xff]  }
  0x58   :  { %846 = vmatprep.subr.bf16.mxu1 %v1405_v54  ;;  %v1487_v54 = vld [vmem:[#allocation5 + $0x2a0] ss:$8 sps:$4 sm:$0xff]  }
  0x5a   :  { %806 = vmatpush2.bf16.msra.mxu0 %v1404_v55  ;;  %v1495_v55 = vld [vmem:[#allocation5 + $0x294] ss:$8 sps:$4 sm:$0xff]  }
  0x5b   :  { %807 = vmatprep.subr.bf16.mxu0 %v1408_v56  ;;  %847 = vmatpush2.bf16.msra.mxu1 %v1407_v57  ;;  %v1493_v56 = vld [vmem:[#allocation5 + $0x290] ss:$8 sps:$4 sm:$0xff]   ;;  %v1501_v57 = vld [vmem:[#allocation5 + $0x284] ss:$8 sps:$4 sm:$0xff]  }
  0x5c   :  { %848 = vmatprep.subr.bf16.mxu1 %v1411_v58  ;;  %v1499_v58 = vld [vmem:[#allocation5 + $0x280] ss:$8 sps:$4 sm:$0xff]  }
  0x5e   :  { %808 = vmatpush2.bf16.msra.mxu0 %v1410_v59  ;;  %v1166_v59 = vcombine.low %v1649_v26, %v1649_v26 }
  0x5f   :  { %809 = vmatprep.subr.bf16.mxu0 %v1414_v60  ;;  %849 = vmatpush2.bf16.msra.mxu1 %v1413_v61  ;;  %v1505_v60 = vld [vmem:[#allocation7 + $0x78] sm:$0xff]  }
  0x60   :  { %850 = vmatprep.subr.bf16.mxu1 %v1417_v62  ;;  %v1506_v61 = vld [vmem:[#allocation7 + $0x38] sm:$0xff]   ;;  %v1507_v62 = vld [vmem:[#allocation7 + $0x70] sm:$0xff]  }
  0x62   :  { %810 = vmatpush2.bf16.msra.mxu0 %v1416_v63  ;;  %v1508_v63 = vld [vmem:[#allocation7 + $0x30] sm:$0xff]  }
  0x63   :  { %811 = vmatprep.subr.bf16.mxu0 %v1420_v0  ;;  %851 = vmatpush2.bf16.msra.mxu1 %v1419_v1  ;;  %v1509_v0 = vld [vmem:[#allocation7 + $0x68] sm:$0xff]  }
  0x64   :  { %852 = vmatprep.subr.bf16.mxu1 %v1423_v2  ;;  %v1510_v1 = vld [vmem:[#allocation7 + $0x28] sm:$0xff]   ;;  %v1511_v2 = vld [vmem:[#allocation7 + $0x60] sm:$0xff]  }
  0x66   :  { %812 = vmatpush2.bf16.msra.mxu0 %v1422_v3  ;;  %v1512_v3 = vld [vmem:[#allocation7 + $0x20] sm:$0xff]  }
  0x67   :  { %863 = vmatprep.subr.bf16.mxu0 %v1430_v4  ;;  %853 = vmatpush2.bf16.msra.mxu1 %v1427_v5  ;;  %v1513_v4 = vld [vmem:[#allocation7 + $0x58] sm:$0xff]  }
  0x68   :  { %904 = vmatprep.subr.bf16.mxu1 %v1456_v7  ;;  %v1514_v5 = vld [vmem:[#allocation7 + $0x18] sm:$0xff]   ;;  %v1516_v7 = vld [vmem:[#allocation7 + $0x10] sm:$0xff]  }
  0x69   :  { %814 = vmatmul.mubr.bf16.vlgmr.msra.gmra.mxu0 %v1162_v6  ;;  %v1515_v6 = vld [vmem:[#allocation7 + $0x50] sm:$0xff]  }
  0x6a   :  { %864 = vmatpush1.bf16.msra.mxu0 %v1428_v8  ;;  %855 = vmatmul.mubr.bf16.vlgmr.msra.gmra.mxu1 %v1164_v9  ;;  %v1517_v8 = vld [vmem:[#allocation7 + $0x48] sm:$0xff]  }
  0x6b   :  { %865 = vmatprep.subr.bf16.mxu0 %v1435_v10  ;;  %905 = vmatpush1.bf16.msra.mxu1 %v1454_v11  ;;  %v1518_v9 = vld [vmem:[#allocation7 + $0x8] sm:$0xff]   ;;  %v1519_v10 = vld [vmem:[#allocation7 + $0x40] sm:$0xff]  }
  0x6c   :  { %936 = vmatprep.mubr.bf16.mxu1 %v1596_v16  ;;  %906 = vmatprep.subr.bf16.mxu1 %v1462_v12  ;;  %v1520_v11 = vld [vmem:[#allocation7] sm:$0xff]  }
  0x6d   :  { %895 = vmatprep.mubr.bf16.mxu0 %v1167_v28 }
  0x6e   :  { %866 = vmatpush1.bf16.msra.mxu0 %v1433_v13 }
  0x6f   :  { %867 = vmatprep.subr.bf16.mxu0 %v1438_v14  ;;  %907 = vmatpush1.bf16.msra.mxu1 %v1460_v15 }
  0x70   :  { %908 = vmatprep.subr.bf16.mxu1 %v1468_v17 }
  0x72   :  { %868 = vmatpush1.bf16.msra.mxu0 %v1436_v18 }
  0x73   :  { %869 = vmatprep.subr.bf16.mxu0 %v1441_v19  ;;  %909 = vmatpush1.bf16.msra.mxu1 %v1466_v21 }
  0x74   :  { %910 = vmatprep.subr.bf16.mxu1 %v1474_v22 }
  0x76   :  { %870 = vmatpush1.bf16.msra.mxu0 %v1439_v20 }
  0x77   :  { %871 = vmatprep.subr.bf16.mxu0 %v1444_v23  ;;  %911 = vmatpush1.bf16.msra.mxu1 %v1472_v24  ;;  %v186_v24 = vlaneseq }
  0x78   :  { %912 = vmatprep.subr.bf16.mxu1 %v1480_v25 }
  0x79   :  { %v187_v25 = vshrl.u32 %v186_v24, 7 }
  0x7a   :  { %872 = vmatpush1.bf16.msra.mxu0 %v1442_v27  ;;  %v184_v27 = vld [vmem:[%s1669_s2] sm:$0x3] }
  0x7b   :  { %873 = vmatprep.subr.bf16.mxu0 %v1447_v29  ;;  %913 = vmatpush1.bf16.msra.mxu1 %v1478_v30  ;;  %v188_v26 = vsub.s32 0, %v187_v25  ;;  %v192_v28 = vsub.s32 1, %v187_v25 }
  0x7c   :  { %914 = vmatprep.subr.bf16.mxu1 %v1486_v31 }
  0x7d   :  { %v189_v29 = vrot.slane %v184_v27, %v188_v26  ;;  %v193_v30 = vrot.slane %v184_v27, %v192_v28 }
  0x7e   :  { %874 = vmatpush1.bf16.msra.mxu0 %v1445_v32 }
  0x7f   :  { %875 = vmatprep.subr.bf16.mxu0 %v1450_v33  ;;  %915 = vmatpush1.bf16.msra.mxu1 %v1484_v34 }
  0x80   :  { %916 = vmatprep.subr.bf16.mxu1 %v1492_v35 }
  0x82   :  { %876 = vmatpush1.bf16.msra.mxu0 %v1448_v36 }
  0x83   :  { %877 = vmatprep.subr.bf16.mxu0 %v1453_v37  ;;  %917 = vmatpush1.bf16.msra.mxu1 %v1490_v38 }
  0x84   :  { %918 = vmatprep.subr.bf16.mxu1 %v1498_v39 }
  0x86   :  { %878 = vmatpush1.bf16.msra.mxu0 %v1451_v40 }
  0x87   :  { %879 = vmatprep.subr.bf16.mxu0 %v1459_v41  ;;  %919 = vmatpush1.bf16.msra.mxu1 %v1496_v42 }
  0x88   :  { %1300 = vmatprep.subr.bf16.mxu1 %v1505_v60 }
  0x8a   :  { %880 = vmatpush2.bf16.msra.mxu0 %v1457_v43  ;;  %937 = vmatmul.mubr.bf16.vlgmr.msra.gmra.mxu1 %v1502_v45 }
  0x8b   :  { %881 = vmatprep.subr.bf16.mxu0 %v1465_v44  ;;  %1301 = vmatpush3.bf16.msra.mxu1 %v1506_v61 }
  0x8c   :  { %1302 = vmatprep.subr.bf16.mxu1 %v1507_v62  ;;  %v1298_v62 = vld [vmem:[#allocation2] ss:$0 sm:$0xff] }
  0x8e   :  { %882 = vmatpush2.bf16.msra.mxu0 %v1463_v46 }
  0x8f   :  { %883 = vmatprep.subr.bf16.mxu0 %v1471_v47  ;;  %1303 = vmatpush3.bf16.msra.mxu1 %v1508_v63 }
  0x90   :  { %1304 = vmatprep.subr.bf16.mxu1 %v1509_v0 }
  0x92   :  { %884 = vmatpush2.bf16.msra.mxu0 %v1469_v48 }
  0x93   :  { %885 = vmatprep.subr.bf16.mxu0 %v1477_v49  ;;  %1305 = vmatpush3.bf16.msra.mxu1 %v1510_v1  ;;  %v1131_v49 = vld [vmem:[%s1672_s5] sm:$0x1] }
  0x94   :  { %1306 = vmatprep.subr.bf16.mxu1 %v1511_v2 }
  0x96   :  { %886 = vmatpush2.bf16.msra.mxu0 %v1475_v50 }
  0x97   :  { %887 = vmatprep.subr.bf16.mxu0 %v1483_v51  ;;  %1307 = vmatpush3.bf16.msra.mxu1 %v1512_v3  ;;  %v1281_v51 = vld [vmem:[%s1671_s4] ss:$0 sm:$0xff] }
  0x98   :  { %1308 = vmatprep.subr.bf16.mxu1 %v1513_v4 }
  0x9a   :  { %888 = vmatpush2.bf16.msra.mxu0 %v1481_v52 }
  0x9b   :  { %889 = vmatprep.subr.bf16.mxu0 %v1489_v53  ;;  %1309 = vmatpush3.bf16.msra.mxu1 %v1514_v5  ;;  %v1132_v53 = vunpack.c.l.bf16 %v1131_v49 }
  0x9c   :  { %1310 = vmatprep.subr.bf16.mxu1 %v1515_v6 }
  0x9e   :  { %890 = vmatpush2.bf16.msra.mxu0 %v1487_v54 }
  0x9f   :  { %891 = vmatprep.subr.bf16.mxu0 %v1495_v55  ;;  %1311 = vmatpush3.bf16.msra.mxu1 %v1516_v7 }
  0xa0   :  { %1312 = vmatprep.subr.bf16.mxu1 %v1517_v8 }
  0xa2   :  { %892 = vmatpush2.bf16.msra.mxu0 %v1493_v56 }
  0xa3   :  { %893 = vmatprep.subr.bf16.mxu0 %v1501_v57  ;;  %1313 = vmatpush3.bf16.msra.mxu1 %v1518_v9 }
  0xa4   :  { %1314 = vmatprep.subr.bf16.mxu1 %v1519_v10 }
  0xa6   :  { %894 = vmatpush2.bf16.msra.mxu0 %v1499_v58  ;;  %v1136_v58 = vrot.slane %v1132_v53, %v188_v26 }
  0xa7   :  { %1315 = vmatpush3.bf16.msra.mxu1 %v1520_v11 }
  0xa9   :  { %896 = vmatmul.mubr.bf16.vlgmr.msra.gmra.mxu0 %v1166_v59 }
 0x129   :  { %v815_v12 = vpop.f32.mrf.mxu0 }
 0x12a   :  { %v856_v14 = vpop.f32.mrf.mxu1  ;;  %v816_v31 = vadd.f32 %v815_v12, %v189_v29 }
 0x12b   :  { %v817_v13 = vpop.f32.mrf.mxu0 }
 0x12c   :  { %v858_v16 = vpop.f32.mrf.mxu1  ;;  %v818_v32 = vadd.f32 %v817_v13, %v193_v30  ;;  %v857_v33 = vadd.f32 %v856_v14, %v816_v31 }
 0x12d   :  { %v819_v15 = vpop.f32.mrf.mxu0 }
 0x12e   :  { %v860_v18 = vpop.f32.mrf.mxu1  ;;  %v859_v35 = vadd.f32 %v858_v16, %v818_v32 }
 0x12f   :  { %v820_v17 = vpop.f32.mrf.mxu0 }
 0x130   :  { %v861_v19 = vpop.f32.mrf.mxu1 }
 0x14a   :  { %v938_v20 = vpop.f32.mrf.mxu1 }
 0x14c   :  { %v940_v21 = vpop.f32.mrf.mxu1 }
 0x14e   :  { %v942_v22 = vpop.f32.mrf.mxu1 }
 0x150   :  { %v943_v23 = vpop.f32.mrf.mxu1 }
 0x169   :  { %v897_v34 = vpop.f32.mrf.mxu0 }
 0x16a   :  { %v898_v36 = vadd.f32 %v897_v34, %v857_v33 }
 0x16b   :  { %v899_v37 = vpop.f32.mrf.mxu0 }
 0x16c   :  { %v939_v38 = vadd.f32 %v938_v20, %v898_v36  ;;  %v900_v39 = vadd.f32 %v899_v37, %v859_v35 }
 0x16d   :  { %v901_v40 = vpop.f32.mrf.mxu0 }
 0x16e   :  { %vm945_vm0 = vcmp.gt.f32.partialorder %v939_v38, 0.0  ;;  %v947_v41 = vmul.f32 0.01, %v939_v38  ;;  %v941_v42 = vadd.f32 %v940_v21, %v900_v39 }
 0x16f   :  { %v902_v43 = vpop.f32.mrf.mxu0 }
 0x170   :  { %v948_v44 = vmul.f32 0.01, %v941_v42  ;;  %vm946_vm1 = vcmp.gt.f32.partialorder %v941_v42, 0.0  ;;  %v949_v45 = vsel %vm945_vm0, %v939_v38, %v947_v41 }
 0x171   :  { %v951_v48 = vpack.c.bf16 %v949_v45, %v949_v45 }
 0x172   :  { %v950_v46 = vsel %vm946_vm1, %v941_v42, %v948_v44 }
 0x173   :  { %v952_v47 = vpack.c.bf16 %v950_v46, %v950_v46 }
 0x175   :  { %1120 = vmatprep.mubr.bf16.mxu1 %v952_v47 }
 0x176   :  { %1121 = vmatmul.mubr.bf16.vlgmr.msra.gmra.mxu1 %v951_v48 }
 0x236   :  { %v1316_v50 = vpop.f32.mrf.mxu1 }
 0x238   :  { %v1317_v52 = vpop.f32.mrf.mxu1 }
 0x239   :  { %v1318_v54 = vadd.f32 %v1317_v52, %v1316_v50 }
 0x23a   :  { %v1319_v55 = vpop.f32.mrf.mxu1 }
 0x23b   :  { %v1123_v56 = vadd.f32 %v1318_v54, %v1281_v51 }
 0x23c   :  { %v1320_v57 = vpop.f32.mrf.mxu1 }
 0x23d   :  { %vm1128_vm2 = vcmp.gt.f32.partialorder %v1123_v56, 0.0  ;;  %v1129_v59 = vmul.f32 0.01, %v1123_v56 }
 0x23f   :  { %v1130_v60 = vsel %vm1128_vm2, %v1123_v56, %v1129_v59 }
 0x240   :  { %v1137_v61 = vmul.f32 %v1136_v58, %v1130_v60 }
 0x242   :  { %1138 = vadd.xlane.f32.xlu0 %v1137_v61 }
 0x2cb   :  { %v1139_v63 = vpop.xlane.xlu0 %1138 }
 0x2cc   :  { %v1147_v0 = vadd.f32 %v1298_v62, %v1139_v63 }
 0x2ce   :  { %v1299_v1 = vmul.f32 -1.442695, %v1147_v0 }
 0x2d0   :  { %1521 = vpow2.f32 %v1299_v1 }
 0x2dd   :  { %v1522_v2 = vpop.eup %1521 }
 0x2de   :  { %v1151_v3 = vadd.f32 1.0, %v1522_v2 }
 0x2e0   :  { %1523 = vrcp.f32 %v1151_v3 }
 0x2ed   :  { %v1524_v4 = vpop.eup %1523 }
 0x2ee   :  { %1155 = vst.msk [vmem:[%s1674_s7] sm:$0xff] %vm1154_vm3, %v1524_v4 }
 0x2ef   :  { %1160 = vsyncpa [#allocation4], 1 }
 0x2f0   :  { %1161 = vsyncpa [#allocation6], 1 }

</bundles_post_ra>
